<compile_context>
chip_gen: v5e
topology: v5e:2x2
jax: 0.10.0
libtpu: 0.0.40
codegen_flags: <defaults>
</compile_context>

<pallas_src>
import functools
import math

import numpy as np
import jax
import jax.numpy as jnp
from jax.experimental import pallas as pl
from jax.experimental.pallas import tpu as pltpu


def _pe_kernel(scale_ref, bias_ref, o_ref, *, tile_rows, width):
    # One (tile_rows, width) slab-block per grid step:
    #   angle[r, c] = (row0 + r) * scale[c] + bias[c] ; out = sin(angle)
    row0 = pl.program_id(0) * tile_rows
    r = (row0 + jax.lax.broadcasted_iota(jnp.int32, (tile_rows, width), 0)
         ).astype(jnp.float32)
    angle = r * scale_ref[...] + bias_ref[...]        # VPU mul+add (row broadcast)
    o_ref[...] = jnp.sin(angle).astype(o_ref.dtype)   # single EUP op per element


def _round_up(x, m):
    return (x + m - 1) // m * m


def positional_encoding(length, d_model=512, *, dtype=jnp.float32, tile_rows=512):
    """Sinusoidal PE table of shape (1, length, d_model)  (== self.pe[:, :length])."""
    # Lane packing: how many positions share one 128-lane-aligned slab row.
    pack = 128 // math.gcd(d_model, 128)     # width = lcm(d_model, 128)
    width = d_model * pack

    itemsize = jnp.dtype(dtype).itemsize
    sub = 16 if itemsize == 2 else 8
    slab_rows = -(-length // pack)                                    # ceil
    tile_rows = max(sub, min(_round_up(tile_rows, sub), _round_up(slab_rows, sub)))
    # Keep a single output tile <= 2 MiB (double-buffered -> <= 4 MiB VMEM).
    max_rows = max(sub, ((2 * 1024 * 1024) // (width * itemsize)) // sub * sub)
    tile_rows = min(tile_rows, max_rows)
    padded_rows = _round_up(slab_rows, tile_rows)
    grid = (padded_rows // tile_rows,)

    # Per-column constants (trace-time numpy). For slab column c:
    #   feature j = c % d_model, position offset off = c // d_model,
    #   div(j)   = exp(-(ln 1e4 / d_model) * (j - j%2))
    #   angle    = (row*pack + off)*div + (pi/2)*(j&1) = row*scale[c] + bias[c]
    c = np.arange(width)
    j = c % d_model
    off = c // d_model
    div = np.exp((j - (j % 2)) * (-(math.log(10000.0) / d_model)))
    scale = (pack * div).astype(np.float32)[None, :]
    bias = (off * div + (math.pi / 2.0) * (j % 2)).astype(np.float32)[None, :]

    slab = pl.pallas_call(
        functools.partial(_pe_kernel, tile_rows=tile_rows, width=width),
        out_shape=jax.ShapeDtypeStruct((padded_rows, width), dtype),
        grid_spec=pltpu.PrefetchScalarGridSpec(
            num_scalar_prefetch=0,
            grid=grid,
            in_specs=[pl.BlockSpec((1, width), lambda i: (0, 0)),
                      pl.BlockSpec((1, width), lambda i: (0, 0))],
            out_specs=pl.BlockSpec((tile_rows, width), lambda i: (i, 0)),
        ),
        compiler_params=pltpu.CompilerParams(
            dimension_semantics=("parallel",)),
    )(jnp.asarray(scale), jnp.asarray(bias))

    # Lane-dense slab -> (length, d_model), then prepend the batch dim.
    table = slab.reshape(padded_rows * pack, d_model)[:length]
    return table[None]


def _reference(length, d_model):
    # Pure-JAX reference reproducing the PyTorch buffer construction exactly.
    pos = jnp.arange(length, dtype=jnp.float32)[:, None]
    div = jnp.exp(jnp.arange(0, d_model, 2, dtype=jnp.float32)
                  * (-(math.log(10000.0) / d_model)))
    pe = jnp.zeros((length, d_model), jnp.float32)
    pe = pe.at[:, 0::2].set(jnp.sin(pos * div))
    pe = pe.at[:, 1::2].set(jnp.cos(pos * div))
    return pe[None]


if __name__ == "__main__":
    # forward() takes only an integer length; the key exists only for the
    # determinism convention and is unused.
    _ = jax.random.PRNGKey(0)

    # Small case: d_model=32 -> pack=4 positions per 128-lane row.
    out = jax.block_until_ready(positional_encoding(16, d_model=32))
    ref = _reference(16, 32)
    assert out.shape == (1, 16, 32), out.shape
    assert out.dtype == jnp.float32
    assert jnp.allclose(out, ref, atol=1e-5, rtol=1e-5), "mismatch (d_model=32)"

    # Module-default d_model (already lane dense), multi-tile grid.
    out2 = jax.block_until_ready(positional_encoding(128, d_model=512, tile_rows=64))
    ref2 = _reference(128, 512)
    assert out2.shape == (1, 128, 512), out2.shape
    # cos(x) is computed as sin(x + pi/2); f32 argument rounding at larger |x|
    # gives ~1e-5..1e-4-scale differences vs the cos-based reference.
    assert jnp.allclose(out2, ref2, atol=2e-4, rtol=1e-5), "mismatch (d_model=512)"

    # d_model not dividing 128 (d_model=80 -> pack=8, width=640, still lane dense).
    out3 = jax.block_until_ready(positional_encoding(24, d_model=80))
    ref3 = _reference(24, 80)
    assert out3.shape == (1, 24, 80), out3.shape
    assert jnp.allclose(out3, ref3, atol=2e-4, rtol=1e-5), "mismatch (d_model=80)"

    print("KERNEL_OK")
</pallas_src>

<mosaic_0001>
module attributes {stable_mosaic.version = 11 : i64} {
  func.func @_pe_kernel(%arg0: i32, %arg1: memref<1x128xf32, #tpu.memory_space<vmem>>, %arg2: memref<1x128xf32, #tpu.memory_space<vmem>>, %arg3: memref<8x128xf32, #tpu.memory_space<vmem>>) attributes {dimension_semantics = [#tpu.dimension_semantics<parallel>], iteration_bounds = array<i64: 1>, scalar_prefetch = 0 : i64, scratch_operands = 0 : i64, tpu.core_type = #tpu.core_type<tc>, window_params = [{pipeline_mode = #tpu.pipeline_mode<synchronous>, transform_indices = @transform_0, window_bounds = array<i64: 1, 128>}, {pipeline_mode = #tpu.pipeline_mode<synchronous>, transform_indices = @transform_1, window_bounds = array<i64: 1, 128>}, {transform_indices = @transform_2, window_bounds = array<i64: 8, 128>}]} {
    %c8_i32 = arith.constant 8 : i32
    %0 = arith.muli %arg0, %c8_i32 : i32
    %1 = tpu.iota {dimensions = array<i32: 0>} : vector<8x128xi32>
    %2 = vector.broadcast %0 : i32 to vector<8x128xi32>
    %3 = arith.addi %2, %1 : vector<8x128xi32>
    %4 = arith.sitofp %3 : vector<8x128xi32> to vector<8x128xf32>
    %c0 = arith.constant 0 : index
    %c0_0 = arith.constant 0 : index
    %5 = vector.load %arg1[%c0, %c0_0] : memref<1x128xf32, #tpu.memory_space<vmem>>, vector<1x128xf32>
    %6 = vector.broadcast %5 : vector<1x128xf32> to vector<8x128xf32>
    %7 = arith.mulf %4, %6 : vector<8x128xf32>
    %c0_1 = arith.constant 0 : index
    %c0_2 = arith.constant 0 : index
    %8 = vector.load %arg2[%c0_1, %c0_2] : memref<1x128xf32, #tpu.memory_space<vmem>>, vector<1x128xf32>
    %9 = vector.broadcast %8 : vector<1x128xf32> to vector<8x128xf32>
    %10 = arith.addf %7, %9 : vector<8x128xf32>
    %11 = math.sin %10 : vector<8x128xf32>
    %c0_3 = arith.constant 0 : index
    %c0_4 = arith.constant 0 : index
    %12 = vector.load %arg3[%c0_3, %c0_4] : memref<8x128xf32, #tpu.memory_space<vmem>>, vector<8x128xf32>
    tpu.vector_store %arg3[%c0_3, %c0_4], %11 {strides = array<i32>} : memref<8x128xf32, #tpu.memory_space<vmem>>, vector<8x128xf32>,
    return
  }
  func.func @transform_0(%arg0: i32) -> (i32, i32) {
    %c0_i32 = arith.constant 0 : i32
    %c0_i32_0 = arith.constant 0 : i32
    %c0_i32_1 = arith.constant 0 : i32
    return %c0_i32, %c0_i32_0 : i32, i32
  }
  func.func @transform_1(%arg0: i32) -> (i32, i32) {
    %c0_i32 = arith.constant 0 : i32
    %c0_i32_0 = arith.constant 0 : i32
    %c0_i32_1 = arith.constant 0 : i32
    return %c0_i32, %c0_i32_0 : i32, i32
  }
  func.func @transform_2(%arg0: i32) -> (i32, i32) {
    %c0_i32 = arith.constant 0 : i32
    %c0_i32_0 = arith.constant 0 : i32
    return %arg0, %c0_i32 : i32, i32
  }
}

</mosaic_0001>

<bundles_post_ra>
// kernel: tpu_custom_call.1
= control target key start
LH: loop header
LB: loop body
LE: loop exit
PB: predicated region body
PF: predicated region fallthrough
CT: control target
= control target key end

     0   :  { %7 = vsyncpa [#allocation3], 0  ;;  %s403_s0 = inlined_call_operand.hbm [shape: f32[1,128], index: 0, kind: input, shape index: {}]   ;;  %s404_s1 = inlined_call_operand.hbm [shape: f32[1,128], index: 1, kind: input, shape index: {}]   ;;  %s405_s2 = inlined_call_operand.hbm [shape: f32[8,128], index: 2, kind: output, shape index: {}]  }
   0x1   :  { %8 = vsyncpa [#allocation6], 0 }
   0x2   :  { %9 = vsyncpa [#allocation4], 0  ;;  %s15_s11 = sshll.u32 %s403_s0, 4  ;;  %s323_s12 = smov [#allocation2]   ;;  %s16_s11 = int_to_ptr.hbm [resolvable:$true] %s15_s11 }
   0x3   :  { %s17_s13 = sshll.u32 %s323_s12, 4  ;;  %s26_s16 = sshll.u32 %s404_s1, 4  ;;  %s18_s13 = int_to_ptr.vmem [resolvable:$true] %s17_s13  ;;  %s27_s16 = int_to_ptr.hbm [resolvable:$true] %s26_s16 }
   0x4   :  { %20 = dma.hbm_to_vmem [thread:$0]  %s16_s11, 16, %s18_s13, [#allocation3]  }
   0x5   :  { %s324_s17 = smov [#allocation5]  }
   0x6   :  { %s28_s18 = sshll.u32 %s324_s17, 4  ;;  %s29_s18 = int_to_ptr.vmem [resolvable:$true] %s28_s18 }
   0x7   :  { %31 = dma.hbm_to_vmem [thread:$0]  %s27_s16, 16, %s29_s18, [#allocation6]  }
   0x8   :  { %317 = dma.done.wait [#allocation3], 16  }
   0x9   :  { %318 = vsyncadd [#allocation3], 4294967280 }
   0xa   :  { %319 = dma.done.wait [#allocation6], 16  }
   0xb   :  { %320 = vsyncadd [#allocation6], 4294967280  ;;  %v41_v0 = vlaneseq  ;;  %v243_v3 = vld [vmem:[#allocation2] ss:$0 sm:$0xff]  ;;  %v244_v4 = vld [vmem:[#allocation5] ss:$0 sm:$0xff] }
   0xc   :  { %v325_v18 = vmov 683565275   ;;  %v326_v20 = vmov 2475754826   ;;  %v327_v22 = vmov 2131351028  }
   0xd   :  { %v42_v1 = vshrl.u32 %v41_v0, 7  ;;  %v328_v24 = vmov 2102212464   ;;  %v329_v26 = vmov 920167782   ;;  %s332_s0 = smov [#allocation7]  }
   0xe   :  { %v330_v32 = vmov 1326507024   ;;  %s217_s1 = sshll.u32 %s332_s0, 4  ;;  %s219_s21 = sshll.u32 %s405_s2, 4  ;;  %s218_s1 = int_to_ptr.vmem [resolvable:$true] %s217_s1  ;;  %s220_s21 = int_to_ptr.hbm [resolvable:$true] %s219_s21 }
   0xf   :  { %v45_v2 = vcvt.s32.f32 %v42_v1 }
  0x11   :  { %v50_v5 = vmul.f32 %v243_v3, %v45_v2 }
  0x13   :  { %v354_v6 = vadd.f32 %v244_v4, %v50_v5 }
  0x15   :  { %v59_v7 = vand.u32 2139095040, %v354_v6  ;;  %v56_v9 = vand.u32 2147483647, %v354_v6  ;;  %vm58_vm12 = vcmp.lt.s32.totalorder %v354_v6, 0 }
  0x17   :  { %v60_v8 = vshrl.u32 %v59_v7, 23  ;;  %v63_v12 = vand.u32 8388607, %v56_v9  ;;  %v331_v7 = vmov 0   ;;  %vm57_vm13 = vcmp.le.f32.partialorder %v56_v9, 0.7853982 }
  0x19   :  { %v230_v10 = vadd.s32 4294967169, %v60_v8  ;;  %v64_v15 = vor.u32 8388608, %v63_v12 }
  0x1b   :  { %v66_v11 = vadd.s32 1, %v230_v10  ;;  %v363_v34 = vshll.u32 %v64_v15, 8 }
  0x1d   :  { %vm67_vm0 = vcmp.gt.s32.totalorder %v66_v11, 0  ;;  %v105_v46 = vand.u32 65535, %v363_v34  ;;  %v106_v47 = vshrl.u32 %v363_v34, 16 }
  0x1e   :  { %v68_v13 = vsel %vm67_vm0, %v66_v11, 0 }
  0x1f   :  { %v70_v14 = vand.u32 31, %v68_v13  ;;  %v360_v16 = vshrl.u32 %v68_v13, 5 }
  0x21   :  { %v71_v17 = vsub.s32 32, %v70_v14  ;;  %v73_v19 = vshll.u32 %v325_v18, %v70_v14  ;;  %v76_v21 = vshll.u32 %v326_v20, %v70_v14  ;;  %v79_v23 = vshll.u32 %v327_v22, %v70_v14 }
  0x22   :  { %v82_v25 = vshll.u32 %v328_v24, %v70_v14  ;;  %v85_v27 = vshll.u32 %v329_v26, %v70_v14  ;;  %vm88_vm1 = vcmp.lt.s32.totalorder %v360_v16, 1  ;;  %vm91_vm2 = vcmp.lt.s32.totalorder %v360_v16, 4 }
  0x23   :  { %v74_v28 = vshrl.u32 %v326_v20, %v71_v17  ;;  %v77_v29 = vshrl.u32 %v327_v22, %v71_v17  ;;  %v80_v30 = vshrl.u32 %v328_v24, %v71_v17  ;;  %v83_v31 = vshrl.u32 %v329_v26, %v71_v17 }
  0x24   :  { %v86_v33 = vshrl.u32 %v330_v32, %v71_v17  ;;  %vm90_vm3 = vcmp.lt.s32.totalorder %v360_v16, 3  ;;  %vm89_vm4 = vcmp.lt.s32.totalorder %v360_v16, 2  ;;  %v72_v54 = vshrl.u32 %v325_v18, %v71_v17 }
  0x25   :  { %v75_v35 = vor.u32 %v74_v28, %v73_v19  ;;  %v78_v36 = vor.u32 %v77_v29, %v76_v21  ;;  %v81_v37 = vor.u32 %v80_v30, %v79_v23  ;;  %v84_v38 = vor.u32 %v83_v31, %v82_v25 }
  0x26   :  { %v87_v39 = vor.u32 %v86_v33, %v85_v27 }
  0x27   :  { %v96_v40 = vsel %vm88_vm1, %v75_v35, %v78_v36  ;;  %v100_v41 = vsel %vm88_vm1, %v78_v36, %v81_v37  ;;  %v97_v42 = vsel %vm91_vm2, %v84_v38, 920167782  ;;  %v92_v3 = vsel %vm88_vm1, %v72_v54, %v75_v35 }
  0x28   :  { %v101_v43 = vsel %vm91_vm2, %v87_v39, 1326507024  ;;  %v98_v44 = vsel %vm90_vm3, %v81_v37, %v97_v42  ;;  %v93_v5 = vsel %vm91_vm2, %v81_v37, 2102212464  ;;  %vm199_vm1 = vweird.f32 %v354_v6 }
  0x29   :  { %v102_v45 = vsel %vm90_vm3, %v84_v38, %v101_v43  ;;  %v99_v48 = vsel %vm89_vm4, %v96_v40, %v98_v44  ;;  %v94_v18 = vsel %vm90_vm3, %v78_v36, %v93_v5 }
  0x2a   :  { %v103_v49 = vsel %vm89_vm4, %v100_v41, %v102_v45  ;;  %v129_v52 = vand.u32 65535, %v99_v48  ;;  %v130_v53 = vshrl.u32 %v99_v48, 16  ;;  %v95_v26 = vsel %vm89_vm4, %v92_v3, %v94_v18 }
  0x2b   :  { %v107_v50 = vand.u32 65535, %v103_v49  ;;  %v108_v51 = vshrl.u32 %v103_v49, 16  ;;  %v149_v30 = vmul.u32 %v363_v34, %v95_v26 }
  0x2c   :  { %v131_v58 = vmul.u32 %v129_v52, %v105_v46  ;;  %v132_v59 = vmul.u32 %v130_v53, %v105_v46  ;;  %v133_v60 = vmul.u32 %v129_v52, %v106_v47  ;;  %v134_v0 = vmul.u32 %v130_v53, %v106_v47 }
  0x2d   :  { %v109_v55 = vmul.u32 %v107_v50, %v105_v46  ;;  %v110_v56 = vmul.u32 %v108_v51, %v105_v46  ;;  %v111_v57 = vmul.u32 %v107_v50, %v106_v47  ;;  %v112_v61 = vmul.u32 %v108_v51, %v106_v47 }
  0x2e   :  { %v135_v1 = vshll.u32 %v132_v59, 16  ;;  %v137_v2 = vshll.u32 %v133_v60, 16  ;;  %v136_v15 = vshrl.u32 %v132_v59, 16  ;;  %v138_v22 = vshrl.u32 %v133_v60, 16 }
  0x2f   :  { %v113_v62 = vshll.u32 %v110_v56, 16  ;;  %v115_v63 = vshll.u32 %v111_v57, 16  ;;  %v114_v11 = vshrl.u32 %v110_v56, 16  ;;  %v116_v19 = vshrl.u32 %v111_v57, 16 }
  0x30   :  { %vm139_vm6 = vc.u32 %v131_v58, %v135_v1  ;;  %v141_v10 = vadd.s32 %v135_v1, %v131_v58 }
  0x31   :  { %vm117_vm5 = vc.u32 %v109_v55, %v113_v62  ;;  %v119_v4 = vadd.s32 %v113_v62, %v109_v55  ;;  %v140_v13 = vsel %vm139_vm6, 1, %v331_v7 }
  0x32   :  { %v118_v8 = vsel %vm117_vm5, 1, %v331_v7  ;;  %v142_v17 = vadd.s32 %v140_v13, %v134_v0  ;;  %vm143_vm8 = vc.u32 %v141_v10, %v137_v2  ;;  %v145_v25 = vadd.s32 %v141_v10, %v137_v2 }
  0x33   :  { %v120_v12 = vadd.s32 %v118_v8, %v112_v61  ;;  %vm121_vm7 = vc.u32 %v119_v4, %v115_v63  ;;  %v144_v21 = vsel %vm143_vm8, 1, %v331_v7 }
  0x34   :  { %v122_v14 = vsel %vm121_vm7, 1, %v331_v7  ;;  %v146_v23 = vadd.s32 %v144_v21, %v142_v17 }
  0x35   :  { %v124_v20 = vadd.s32 %v122_v14, %v120_v12 }
  0x36   :  { %v147_v27 = vadd.s32 %v146_v23, %v136_v15 }
  0x37   :  { %v125_v24 = vadd.s32 %v124_v20, %v114_v11 }
  0x38   :  { %v148_v29 = vadd.s32 %v147_v27, %v138_v22 }
  0x39   :  { %v126_v28 = vadd.s32 %v125_v24, %v116_v19 }
  0x3a   :  { %v152_v31 = vadd.s32 1, %v148_v29 }
  0x3b   :  { %vm151_vm9 = vc.u32 %v126_v28, %v145_v25  ;;  %v150_v16 = vadd.s32 %v145_v25, %v126_v28 }
  0x3c   :  { %v153_v32 = vsel %vm151_vm9, %v152_v31, %v148_v29 }
  0x3d   :  { %v154_v33 = vadd.s32 %v153_v32, %v149_v30 }
  0x3f   :  { %v155_v35 = vadd.s32 536870912, %v154_v33 }
  0x41   :  { %v156_v36 = vshrl.u32 %v155_v35, 30 }
  0x43   :  { %v157_v37 = vshll.u32 %v156_v36, 30  ;;  %v180_v54 = vsub.s32 4, %v156_v36 }
  0x45   :  { %v158_v38 = vsub.s32 %v154_v33, %v157_v37  ;;  %v181_v57 = vsel %vm58_vm12, %v180_v54, %v156_v36 }
  0x46   :  { %v183_v60 = vsel %vm57_vm13, 0, %v181_v57 }
  0x47   :  { %vm159_vm10 = vcmp.lt.s32.totalorder %v158_v38, 0  ;;  %v160_v39 = vsub.s32 0, %v158_v38  ;;  %v200_v1 = vadd.s32 3, %v183_v60 }
  0x49   :  { %v161_v40 = vsel %vm159_vm10, %v160_v39, %v158_v38  ;;  %v201_v7 = vand.u32 3, %v200_v1 }
  0x4a   :  { %v162_v41 = vclz %v161_v40 }
  0x4b   :  { %vm206_vm14 = vcmp.eq.s32.totalorder %v201_v7, 2  ;;  %vm203_vm15 = vcmp.eq.s32.totalorder %v201_v7, 0  ;;  %vm202_vm0 = vcmp.lt.s32.totalorder %v201_v7, 2 }
  0x4c   :  { %v231_v42 = vadd.s32 4294967294, %v162_v41 }
  0x4e   :  { %vm232_vm11 = vcmp.lt.s32.totalorder %v231_v42, 0 }
  0x4f   :  { %v165_v43 = vsel %vm232_vm11, 0, %v231_v42 }
  0x50   :  { %v166_v44 = vsub.s32 32, %v165_v43  ;;  %v167_v45 = vshll.u32 %v158_v38, %v165_v43  ;;  %v170_v46 = vsub.s32 4294967266, %v165_v43 }
  0x52   :  { %v168_v34 = vshrl.u32 %v150_v16, %v166_v44  ;;  %v171_v47 = vadd.s32 127, %v170_v46 }
  0x54   :  { %v169_v48 = vor.u32 %v168_v34, %v167_v45  ;;  %v172_v49 = vshll.u32 %v171_v47, 23 }
  0x56   :  { %v173_v50 = vor.u32 4788187, %v172_v49  ;;  %v176_v51 = vcvt.s32.f32 %v169_v48 }
  0x58   :  { %v174_v52 = vand.u32 2147483647, %v173_v50 }
  0x5a   :  { %v177_v53 = vmul.f32 %v176_v51, %v174_v52 }
  0x5c   :  { %v178_v55 = vxor.u32 2147483648, %v177_v53 }
  0x5e   :  { %v179_v56 = vsel %vm58_vm12, %v178_v55, %v177_v53 }
  0x5f   :  { %v182_v58 = vsel %vm57_vm13, %v354_v6, %v179_v56 }
  0x60   :  { %v184_v59 = vmul.f32 %v182_v58, %v182_v58 }
  0x62   :  { %v185_v61 = vmul.f32 -0.001358992, %v184_v59  ;;  %v192_v62 = vmul.f32 -0.00019511016, %v184_v59 }
  0x64   :  { %v186_v63 = vadd.f32 0.041655596, %v185_v61  ;;  %v193_v0 = vadd.f32 0.008332121, %v192_v62 }
  0x66   :  { %v187_v2 = vmul.f32 %v186_v63, %v184_v59  ;;  %v194_v3 = vmul.f32 %v193_v0, %v184_v59 }
  0x68   :  { %v188_v4 = vadd.f32 -0.4999988, %v187_v2  ;;  %v195_v5 = vadd.f32 -0.16666654, %v194_v3 }
  0x6a   :  { %v189_v8 = vmul.f32 %v188_v4, %v184_v59  ;;  %v196_v10 = vmul.f32 %v195_v5, %v184_v59 }
  0x6c   :  { %v190_v9 = vadd.f32 1.0, %v189_v8  ;;  %v197_v11 = vadd.f32 1.0, %v196_v10 }
  0x6e   :  { %v198_v12 = vmul.f32 %v197_v11, %v182_v58  ;;  %v207_v13 = vxor.u32 2147483648, %v190_v9 }
  0x70   :  { %v204_v14 = vxor.u32 2147483648, %v198_v12  ;;  %v208_v15 = vsel %vm206_vm14, %v207_v13, %v198_v12 }
  0x72   :  { %v205_v17 = vsel %vm203_vm15, %v190_v9, %v204_v14 }
  0x73   :  { %v209_v18 = vsel %vm202_vm0, %v205_v17, %v208_v15 }
  0x74   :  { %v210_v19 = vsel %vm199_vm1, nan, %v209_v18 }
  0x75   :  { %211 = vst [vmem:[#allocation7] sm:$0xff] %v210_v19 }
  0x76   :  { %222 = dma.vmem_to_hbm [thread:$0]  %s218_s1, 128, %s220_s21, [#allocation4]  }
  0x77   :  { %321 = dma.done.wait [#allocation4], 128  }
  0x78   :  { %322 = vsyncadd [#allocation4], 4294967168 }
  0x79   :  { %227 = vsyncpa [#allocation3], 1 }
  0x7a   :  { %228 = vsyncpa [#allocation6], 1 }
  0x7b   :  { %229 = vsyncpa [#allocation4], 1 }

</bundles_post_ra>
